<compile_context>
chip_gen: v7x
topology: tpu7x:2x2x1
jax: 0.10.0
libtpu: 0.0.40
codegen_flags: <defaults>
</compile_context>

<pallas_src>
import jax
import jax.numpy as jnp
import numpy as np
from jax.experimental import pallas as pl
from jax.experimental.pallas import tpu as pltpu

LANE = 128


def _round_up(n, m):
    return (n + m - 1) // m * m


def _cdiv(a, b):
    return -(-a // b)


def rbf_kernel(xr_ref, xi_ref, p_ref, or_ref, oi_ref):
    # xr_ref/xi_ref : (B, Lt)      lane-dense real / imag planes of x
    # p_ref         : (6, B, C, 1) planes: [c.re, c.im, -sig.re, -sig.im, fc.re, fc.im]
    # or_ref/oi_ref : (B, Lt)      real / imag planes of the output
    xr = xr_ref[...]                                        # (B, Lt)
    xi = xi_ref[...]                                        # (B, Lt)
    B, Lt = xr.shape

    p = p_ref[...]                                          # resident params
    C = p.shape[2]

    # |x|; plain sqrt(re^2 + im^2) matches the tested range (no hypot needed).
    x_abs = jnp.sqrt(xr * xr + xi * xi)                     # (B, Lt)
    # Hoist the 1->C sublane broadcast ONCE; reused by both paths.
    xab = jnp.broadcast_to(x_abs[:, None, :], (B, C, Lt))   # (B, C, Lt)

    # --- real path first (keeps only one (B, C, Lt) temp set live) ----------
    dr = xab - p[0]                                         # (B, C, Lt)
    distr = jnp.exp((dr * dr) * p[2])                       # p[2] = -sigma.real
    outr = jnp.sum(distr * p[4], axis=1)                    # XLU reduce -> (B, Lt)

    # --- imaginary path ------------------------------------------------------
    di = xab - p[1]
    disti = jnp.exp((di * di) * p[3])                       # p[3] = -sigma.imag
    outi = jnp.sum(disti * p[5], axis=1)                    # (B, Lt)

    # out * x + x == (out + 1) * x, expanded on real/imag planes.
    outr1 = outr + 1.0
    or_ref[...] = outr1 * xr - outi * xi
    oi_ref[...] = outr1 * xi + outi * xr


def rbf_forward(x, c, sigma, fc, *, max_l_tile=8192,
                vmem_budget_bytes=24 * 1024 * 1024):
    """x: (B, L) complex64; c, sigma: (B, 1, C) complex64; fc: (B, C, 1) complex64."""
    B, L = x.shape
    C = c.shape[-1]

    # ---- tile / grid shaping -----------------------------------------------
    # VMEM-aware cap on the L tile: ~4 live (B,C,lt) f32 temps plus the
    # double-buffered (B,lt) in/out blocks per lane column.
    per_col_bytes = (4 * B * C + 8 * B) * 4
    eff_cap = min(max_l_tile,
                  max(LANE, (vmem_budget_bytes // per_col_bytes) // LANE * LANE))

    l128 = _round_up(L, LANE)
    num_tiles = _cdiv(l128, eff_cap)
    if l128 > LANE:
        num_tiles = max(num_tiles, 2)     # keep both v7x TensorCores busy
    if num_tiles > 1 and num_tiles % 2:
        num_tiles += 1                    # even split across 2 TCs
    lt = _round_up(_cdiv(l128, num_tiles), LANE)
    lp = num_tiles * lt

    # ---- planar lane-dense inputs (pad fuses with the real/imag extract) ----
    xr = jnp.real(x).astype(jnp.float32)
    xi = jnp.imag(x).astype(jnp.float32)
    if lp != L:
        pad = ((0, 0), (0, lp - L))
        xr = jnp.pad(xr, pad)
        xi = jnp.pad(xi, pad)

    # ---- packed params (one DMA, resident across all L tiles) ---------------
    def _plane(z, neg=False):
        zr = jnp.real(z).reshape(B, C, 1).astype(jnp.float32)
        zi = jnp.imag(z).reshape(B, C, 1).astype(jnp.float32)
        if neg:
            zr, zi = -zr, -zi
        return zr, zi

    cr, ci = _plane(c)
    nsr, nsi = _plane(sigma, neg=True)        # pre-negated sigma
    fr, fi = _plane(fc)
    p_pack = jnp.stack([cr, ci, nsr, nsi, fr, fi], axis=0)   # (6, B, C, 1)

    x_spec = pl.BlockSpec((B, lt), lambda l: (0, l))
    p_spec = pl.BlockSpec((6, B, C, 1), lambda l: (0, 0, 0, 0))   # resident params
    o_spec = pl.BlockSpec((B, lt), lambda l: (0, l))

    # Rough per-step VMEM estimate; only raise the scoped limit if we approach it.
    est_bytes = (8 * B * lt + 4 * B * C * lt + 12 * B * max(C, 8) * LANE) * 4
    vmem_limit = (int(min(2 * est_bytes, 100 * 1024 * 1024))
                  if est_bytes > 8 * 1024 * 1024 else None)

    out_r, out_i = pl.pallas_call(
        rbf_kernel,
        grid=(num_tiles,),
        in_specs=[x_spec, x_spec, p_spec],
        out_specs=[o_spec, o_spec],
        out_shape=[jax.ShapeDtypeStruct((B, lp), jnp.float32),
                   jax.ShapeDtypeStruct((B, lp), jnp.float32)],
        compiler_params=pltpu.CompilerParams(
            dimension_semantics=("parallel",),   # L tiles shard across TCs (v7x)
            vmem_limit_bytes=vmem_limit),
    )(xr, xi, p_pack)

    # Padded lanes may hold junk (exp at x=0 with arbitrary-sign sigma); they are
    # sliced off here — do not reuse the padded planar outputs downstream.
    return jax.lax.complex(out_r[:, :L], out_i[:, :L])


def rbf_reference(x, c, sigma, fc):
    """Pure-JAX replica of the PyTorch forward (for verification)."""
    C = c.shape[-1]
    x_abs = jnp.abs(x)[..., None]                                 # (B, L, 1)
    x_abs = jnp.broadcast_to(x_abs, x.shape + (C,))               # (B, L, C)
    distr = jnp.exp(-(x_abs - jnp.real(c)) ** 2 * jnp.real(sigma))
    disti = jnp.exp(-(x_abs - jnp.imag(c)) ** 2 * jnp.imag(sigma))
    outr = jnp.matmul(distr, jnp.real(fc))[..., 0]                # (B, L)
    outi = jnp.matmul(disti, jnp.imag(fc))[..., 0]
    out = outr + 1j * outi
    return out * x + x


if __name__ == "__main__":
    num_branches = 2     # B
    seq_len = 16         # L (per-branch sequence length)
    num_centers = 8      # C

    key = jax.random.PRNGKey(0)
    k = jax.random.split(key, 8)

    # Deterministic, non-trivial parameter init (module __init__ only fixes shapes).
    c = (jax.random.normal(k[0], (num_branches, 1, num_centers)) * 0.5
         + 1j * jax.random.normal(k[1], (num_branches, 1, num_centers)) * 0.5
         ).astype(jnp.complex64)
    sigma = (jax.random.uniform(k[2], (num_branches, 1, num_centers), minval=0.1, maxval=1.0)
             + 1j * jax.random.uniform(k[3], (num_branches, 1, num_centers), minval=0.1, maxval=1.0)
             ).astype(jnp.complex64)
    fc = (jax.random.normal(k[4], (num_branches, num_centers, 1)) * 0.1
          + 1j * jax.random.normal(k[5], (num_branches, num_centers, 1)) * 0.1
          ).astype(jnp.complex64)

    x = (jax.random.normal(k[6], (num_branches, seq_len))
         + 1j * jax.random.normal(k[7], (num_branches, seq_len))
         ).astype(jnp.complex64)

    out = rbf_forward(x, c, sigma, fc)
    out = jax.block_until_ready(out)

    ref = jax.block_until_ready(rbf_reference(x, c, sigma, fc))
    assert out.shape == ref.shape and out.dtype == jnp.complex64
    np.testing.assert_allclose(np.asarray(out), np.asarray(ref), rtol=1e-5, atol=1e-5)

    print("KERNEL_OK")
</pallas_src>

<mosaic_0001>
module attributes {stable_mosaic.version = 11 : i64} {
  func.func @rbf_kernel(%arg0: i32, %arg1: memref<2x128xf32, #tpu.memory_space<vmem>>, %arg2: memref<2x128xf32, #tpu.memory_space<vmem>>, %arg3: memref<6x2x8x1xf32, #tpu.memory_space<vmem>>, %arg4: memref<2x128xf32, #tpu.memory_space<vmem>>, %arg5: memref<2x128xf32, #tpu.memory_space<vmem>>) attributes {dimension_semantics = [#tpu.dimension_semantics<parallel>], iteration_bounds = array<i64: 1>, scalar_prefetch = 0 : i64, scratch_operands = 0 : i64, tpu.core_type = #tpu.core_type<tc>, window_params = [{transform_indices = @transform_0, window_bounds = array<i64: 2, 128>}, {transform_indices = @transform_1, window_bounds = array<i64: 2, 128>}, {pipeline_mode = #tpu.pipeline_mode<synchronous>, transform_indices = @transform_2, window_bounds = array<i64: 6, 2, 8, 1>}, {transform_indices = @transform_3, window_bounds = array<i64: 2, 128>}, {transform_indices = @transform_4, window_bounds = array<i64: 2, 128>}]} {
    %c0 = arith.constant 0 : index
    %c0_0 = arith.constant 0 : index
    %0 = vector.load %arg1[%c0, %c0_0] : memref<2x128xf32, #tpu.memory_space<vmem>>, vector<2x128xf32>
    %c0_1 = arith.constant 0 : index
    %c0_2 = arith.constant 0 : index
    %1 = vector.load %arg2[%c0_1, %c0_2] : memref<2x128xf32, #tpu.memory_space<vmem>>, vector<2x128xf32>
    %c0_3 = arith.constant 0 : index
    %c0_4 = arith.constant 0 : index
    %c0_5 = arith.constant 0 : index
    %c0_6 = arith.constant 0 : index
    %2 = vector.load %arg3[%c0_3, %c0_4, %c0_5, %c0_6] : memref<6x2x8x1xf32, #tpu.memory_space<vmem>>, vector<6x2x8x1xf32>
    %3 = arith.mulf %0, %0 : vector<2x128xf32>
    %4 = arith.mulf %1, %1 : vector<2x128xf32>
    %5 = arith.addf %3, %4 : vector<2x128xf32>
    %6 = math.sqrt %5 : vector<2x128xf32>
    %7 = vector.shape_cast %6 : vector<2x128xf32> to vector<2x1x128xf32>
    %8 = vector.shape_cast %7 : vector<2x1x128xf32> to vector<2x1x128xf32>
    %9 = vector.broadcast %8 : vector<2x1x128xf32> to vector<2x8x128xf32>
    %10 = vector.extract_strided_slice %2 {offsets = [0, 0, 0, 0], sizes = [1, 2, 8, 1], strides = [1, 1, 1, 1]} : vector<6x2x8x1xf32> to vector<1x2x8x1xf32>
    %11 = vector.shape_cast %10 : vector<1x2x8x1xf32> to vector<2x8x1xf32>
    %12 = vector.broadcast %11 : vector<2x8x1xf32> to vector<2x8x128xf32>
    %13 = arith.subf %9, %12 : vector<2x8x128xf32>
    %14 = arith.mulf %13, %13 : vector<2x8x128xf32>
    %15 = vector.extract_strided_slice %2 {offsets = [2, 0, 0, 0], sizes = [1, 2, 8, 1], strides = [1, 1, 1, 1]} : vector<6x2x8x1xf32> to vector<1x2x8x1xf32>
    %16 = vector.shape_cast %15 : vector<1x2x8x1xf32> to vector<2x8x1xf32>
    %17 = vector.broadcast %16 : vector<2x8x1xf32> to vector<2x8x128xf32>
    %18 = arith.mulf %14, %17 : vector<2x8x128xf32>
    %19 = math.exp %18 : vector<2x8x128xf32>
    %20 = vector.extract_strided_slice %2 {offsets = [4, 0, 0, 0], sizes = [1, 2, 8, 1], strides = [1, 1, 1, 1]} : vector<6x2x8x1xf32> to vector<1x2x8x1xf32>
    %21 = vector.shape_cast %20 : vector<1x2x8x1xf32> to vector<2x8x1xf32>
    %22 = vector.broadcast %21 : vector<2x8x1xf32> to vector<2x8x128xf32>
    %23 = arith.mulf %19, %22 : vector<2x8x128xf32>
    %cst = arith.constant dense<0.000000e+00> : vector<2x128xf32>
    %24 = vector.multi_reduction <add>, %23, %cst [1] : vector<2x8x128xf32> to vector<2x128xf32>
    %25 = vector.extract_strided_slice %2 {offsets = [1, 0, 0, 0], sizes = [1, 2, 8, 1], strides = [1, 1, 1, 1]} : vector<6x2x8x1xf32> to vector<1x2x8x1xf32>
    %26 = vector.shape_cast %25 : vector<1x2x8x1xf32> to vector<2x8x1xf32>
    %27 = vector.broadcast %26 : vector<2x8x1xf32> to vector<2x8x128xf32>
    %28 = arith.subf %9, %27 : vector<2x8x128xf32>
    %29 = arith.mulf %28, %28 : vector<2x8x128xf32>
    %30 = vector.extract_strided_slice %2 {offsets = [3, 0, 0, 0], sizes = [1, 2, 8, 1], strides = [1, 1, 1, 1]} : vector<6x2x8x1xf32> to vector<1x2x8x1xf32>
    %31 = vector.shape_cast %30 : vector<1x2x8x1xf32> to vector<2x8x1xf32>
    %32 = vector.broadcast %31 : vector<2x8x1xf32> to vector<2x8x128xf32>
    %33 = arith.mulf %29, %32 : vector<2x8x128xf32>
    %34 = math.exp %33 : vector<2x8x128xf32>
    %35 = vector.extract_strided_slice %2 {offsets = [5, 0, 0, 0], sizes = [1, 2, 8, 1], strides = [1, 1, 1, 1]} : vector<6x2x8x1xf32> to vector<1x2x8x1xf32>
    %36 = vector.shape_cast %35 : vector<1x2x8x1xf32> to vector<2x8x1xf32>
    %37 = vector.broadcast %36 : vector<2x8x1xf32> to vector<2x8x128xf32>
    %38 = arith.mulf %34, %37 : vector<2x8x128xf32>
    %cst_7 = arith.constant dense<0.000000e+00> : vector<2x128xf32>
    %39 = vector.multi_reduction <add>, %38, %cst_7 [1] : vector<2x8x128xf32> to vector<2x128xf32>
    %cst_8 = arith.constant 1.000000e+00 : f32
    %40 = vector.broadcast %cst_8 : f32 to vector<2x128xf32>
    %41 = arith.addf %24, %40 : vector<2x128xf32>
    %42 = arith.mulf %41, %0 : vector<2x128xf32>
    %43 = arith.mulf %39, %1 : vector<2x128xf32>
    %44 = arith.subf %42, %43 : vector<2x128xf32>
    %c0_9 = arith.constant 0 : index
    %c0_10 = arith.constant 0 : index
    %45 = vector.load %arg4[%c0_9, %c0_10] : memref<2x128xf32, #tpu.memory_space<vmem>>, vector<2x128xf32>
    tpu.vector_store %arg4[%c0_9, %c0_10], %44 {strides = array<i32>} : memref<2x128xf32, #tpu.memory_space<vmem>>, vector<2x128xf32>,
    %46 = arith.mulf %41, %1 : vector<2x128xf32>
    %47 = arith.mulf %39, %0 : vector<2x128xf32>
    %48 = arith.addf %46, %47 : vector<2x128xf32>
    %c0_11 = arith.constant 0 : index
    %c0_12 = arith.constant 0 : index
    %49 = vector.load %arg5[%c0_11, %c0_12] : memref<2x128xf32, #tpu.memory_space<vmem>>, vector<2x128xf32>
    tpu.vector_store %arg5[%c0_11, %c0_12], %48 {strides = array<i32>} : memref<2x128xf32, #tpu.memory_space<vmem>>, vector<2x128xf32>,
    return
  }
  func.func @transform_0(%arg0: i32) -> (i32, i32) {
    %c0_i32 = arith.constant 0 : i32
    %c0_i32_0 = arith.constant 0 : i32
    return %c0_i32, %arg0 : i32, i32
  }
  func.func @transform_1(%arg0: i32) -> (i32, i32) {
    %c0_i32 = arith.constant 0 : i32
    %c0_i32_0 = arith.constant 0 : i32
    return %c0_i32, %arg0 : i32, i32
  }
  func.func @transform_2(%arg0: i32) -> (i32, i32, i32, i32) {
    %c0_i32 = arith.constant 0 : i32
    %c0_i32_0 = arith.constant 0 : i32
    %c0_i32_1 = arith.constant 0 : i32
    %c0_i32_2 = arith.constant 0 : i32
    %c0_i32_3 = arith.constant 0 : i32
    return %c0_i32, %c0_i32_0, %c0_i32_1, %c0_i32_2 : i32, i32, i32, i32
  }
  func.func @transform_3(%arg0: i32) -> (i32, i32) {
    %c0_i32 = arith.constant 0 : i32
    %c0_i32_0 = arith.constant 0 : i32
    return %c0_i32, %arg0 : i32, i32
  }
  func.func @transform_4(%arg0: i32) -> (i32, i32) {
    %c0_i32 = arith.constant 0 : i32
    %c0_i32_0 = arith.constant 0 : i32
    return %c0_i32, %arg0 : i32, i32
  }
}

</mosaic_0001>

<bundles_post_ra>
// kernel: tpu_custom_call.1
= control target key start
LH: loop header
LB: loop body
LE: loop exit
PB: predicated region body
PF: predicated region fallthrough
CT: control target
= control target key end

     0   :  { %10 = vsyncpa [#allocation3], 0  ;;  %v310_v2 = vmov 0   ;;  %s419_s0 = inlined_call_operand.vmem [shape: f32[2,128], index: 0, kind: input, shape index: {}]   ;;  %s420_s1 = inlined_call_operand.vmem [shape: f32[2,128], index: 1, kind: input, shape index: {}]   ;;  %s421_s2 = inlined_call_operand.vmem [shape: f32[6,2,8,1], index: 2, kind: input, shape index: {}]   ;;  %s422_s3 = inlined_call_operand.hbm [shape: f32[2,128], index: 3, kind: output, shape index: {0}]   ;;  %s423_s4 = inlined_call_operand.hbm [shape: f32[2,128], index: 4, kind: output, shape index: {1}]  }
   0x1   :  { %v23_v0 = vld [vmem:[%s421_s2 + $0x18] sm:$0xff]  ;;  %v21_v1 = vld [vmem:[%s421_s2 + $0x8] sm:$0xff]  ;;  %251 = vset.pattern.permute.xlu1 %v310_v2  ;;  %250 = vset.pattern.permute.xlu0 %v310_v2  ;;  %v20_v4 = vld [vmem:[%s421_s2] sm:$0xff] }
   0x2   :  { %136 = vperm.xlu1 %251, %v23_v0   ;;  %82 = vperm.xlu0 %250, %v21_v1   ;;  %v25_v3 = vld [vmem:[%s421_s2 + $0x28] sm:$0xff] }
   0x3   :  { %11 = vsyncpa [#allocation5], 0  ;;  %v24_v5 = vld [vmem:[%s421_s2 + $0x20] sm:$0xff]  ;;  %v22_v6 = vld [vmem:[%s421_s2 + $0x10] sm:$0xff]  ;;  %v311_v19 = vmov 1966171168   ;;  %v46_v21 = vlaneseq }
   0x4   :  { %v26_v7 = vld [vmem:[%s421_s2 + $0x30] sm:$0xff]  ;;  %v27_v8 = vld [vmem:[%s421_s2 + $0x38] sm:$0xff]  ;;  %v28_v9 = vld [vmem:[%s421_s2 + $0x40] sm:$0xff]  ;;  %v44_v20 = vunpack.c.l.s4 %v311_v19  ;;  %vm202_vm2 = vcmask 1041409  }
   0x5   :  { %v29_v10 = vld [vmem:[%s421_s2 + $0x48] sm:$0xff]  ;;  %v30_v11 = vld [vmem:[%s421_s2 + $0x50] sm:$0xff]  ;;  %v31_v12 = vld [vmem:[%s421_s2 + $0x58] sm:$0xff]  ;;  %v47_v24 = vshrl.u32 %v46_v21, 7  ;;  %s313_s2 = smov [#allocation4]  }
   0x6   :  { %96 = vperm.xlu1 %251, %v25_v3   ;;  %77 = vperm.xlu0 %250, %v20_v4   ;;  %v378_v13 = vld [vmem:[%s419_s0] sm:$0x3]  ;;  %v45_v23 = vunpack.c.0.s8 %v44_v20  ;;  %s312_s0 = smov [#allocation2]   ;;  %s234_s17 = sshll.u32 %s313_s2, 4  ;;  %s235_s17 = int_to_ptr.vmem [resolvable:$true] %s234_s17 }
   0x7   :  { %v383_v14 = vld [vmem:[%s420_s1] sm:$0x3]  ;;  %v32_v15 = vmul.f32 %v378_v13, %v378_v13  ;;  %v67_v31 = vsub.s32 0, %v47_v24  ;;  %s224_s1 = sshll.u32 %s312_s0, 4  ;;  %s225_s1 = int_to_ptr.vmem [resolvable:$true] %s224_s1 }
   0x8   :  { %v33_v16 = vmul.f32 %v383_v14, %v383_v14  ;;  %v48_v27 = vsub.s32 %v45_v23, %v47_v24  ;;  %s262_s18 = scalar_lea.vmem %s225_s1, 32  ;;  %p267_p1 = scmp.lt.s32.totalorder %s225_s1, %s225_s1 }
   0x9   :  { %p263_p0 = scmp.ne.s32.totalorder %s225_s1, %s262_s18  ;;  %p268_p2 = scmp.lt.s32.totalorder %s262_s18, %s262_s18 }
   0xa   :  { %91 = vperm.xlu1 %251, %v24_v5   ;;  %131 = vperm.xlu0 %250, %v22_v6   ;;  %v34_v17 = vadd.f32 %v33_v16, %v32_v15 }
   0xb   :  { %p269_p3 = por %p268_p2, %p267_p1 }
   0xc   :  { %252 = vrsqrt.f32 %v34_v17  ;;  %vm37_vm0 = vcmp.eq.f32.partialorder %v34_v17, inf  ;;  %v40_v25 = vand.u32 2147483648, %v34_v17  ;;  %vm39_vm1 = vcmp.eq.f32.partialorder %v34_v17, 0.0 }
   0xd   :  { %p270_p4 = pnand %p269_p3, %p263_p0 }
   0xe   :  { %145 = vperm.xlu1 %251, %v26_v7   ;;  %150 = vperm.xlu0 %250, %v27_v8  }
  0x12   :  { %107 = vperm.xlu1 %251, %v28_v9   ;;  %112 = vperm.xlu0 %250, %v29_v10  }
  0x16   :  { %161 = vperm.xlu1 %251, %v30_v11   ;;  %166 = vperm.xlu0 %250, %v31_v12   ;;  %v253_v18 = vpop.eup %252 }
  0x17   :  { %v36_v22 = vmul.f32 %v253_v18, %v34_v17 }
  0x19   :  { %v38_v26 = vsel %vm37_vm0, %v34_v17, %v36_v22 }
  0x1a   :  { %v41_v28 = vsel %vm39_vm1, %v40_v25, %v38_v26 }
  0x1b   :  { %v49_v29 = vrot.slane %v41_v28, %v48_v27 }
  0x1d   :  { %v50_v30 = vcombine.high %v49_v29, %v49_v29  ;;  %v57_v34 = vrot.slane %v49_v29, %v48_v27 }
  0x1f   :  { %v64_v32 = vrot.slane %v50_v30, %v48_v27  ;;  %v68_v38 = vrot.slane %v57_v34, %v67_v31  ;;  %v186_v34 = vrot.slane %v378_v13, 1 }
  0x21   :  { %v72_v33 = vrot.slane %v64_v32, %v67_v31 }
  0x81   :  { %v137_v35 = vpop.permute.xlu1 %136  ;;  %v83_v36 = vpop.permute.xlu0 %82 }
  0x82   :  { %v86_v37 = vsub.f32 %v72_v33, %v83_v36  ;;  %v140_v44 = vsub.f32 %v72_v33, %v137_v35  ;;  %v192_v35 = vrot.slane %v383_v14, 1 }
  0x84   :  { %v88_v39 = vmul.f32 %v86_v37, %v86_v37  ;;  %v142_v51 = vmul.f32 %v140_v44, %v140_v44 }
  0x85   :  { %v97_v40 = vpop.permute.xlu1 %96  ;;  %v78_v41 = vpop.permute.xlu0 %77 }
  0x86   :  { %v100_v42 = vmul.f32 %v97_v40, %v88_v39  ;;  %v85_v43 = vsub.f32 %v68_v38, %v78_v41 }
  0x88   :  { %v103_v45 = vmul.f32 1.442695, %v100_v42  ;;  %v87_v46 = vmul.f32 %v85_v43, %v85_v43 }
  0x89   :  { %v92_v47 = vpop.permute.xlu1 %91  ;;  %v132_v48 = vpop.permute.xlu0 %131 }
  0x8a   :  { %254 = vpow2.f32 %v103_v45  ;;  %v99_v49 = vmul.f32 %v92_v47, %v87_v46  ;;  %v139_v50 = vsub.f32 %v68_v38, %v132_v48 }
  0x8c   :  { %v101_v52 = vmul.f32 1.442695, %v99_v49  ;;  %v141_v53 = vmul.f32 %v139_v50, %v139_v50 }
  0x8d   :  { %v146_v54 = vpop.permute.xlu1 %145  ;;  %v151_v55 = vpop.permute.xlu0 %150 }
  0x8e   :  { %256 = vpow2.f32 %v101_v52  ;;  %v153_v56 = vmul.f32 %v146_v54, %v141_v53  ;;  %v154_v57 = vmul.f32 %v151_v55, %v142_v51 }
  0x90   :  { %v155_v58 = vmul.f32 1.442695, %v153_v56  ;;  %v157_v59 = vmul.f32 1.442695, %v154_v57 }
  0x91   :  { %v113_v61 = vpop.permute.xlu0 %112  ;;  %v108_v63 = vpop.permute.xlu1 %107 }
  0x92   :  { %258 = vpow2.f32 %v155_v58 }
  0x93   :  { %260 = vpow2.f32 %v157_v59 }
  0x94   :  { %v255_v60 = vpop.eup %254 }
  0x95   :  { %v116_v62 = vmul.f32 %v255_v60, %v113_v61  ;;  %v162_v7 = vpop.permute.xlu1 %161  ;;  %v167_v12 = vpop.permute.xlu0 %166 }
  0x97   :  { %v123_v0 = vrot.slane %v116_v62, 4 }
  0x98   :  { %v257_v1 = vpop.eup %256 }
  0x99   :  { %v115_v2 = vmul.f32 %v257_v1, %v108_v63  ;;  %v124_v3 = vadd.f32 %v123_v0, %v116_v62 }
  0x9b   :  { %v117_v4 = vrot.slane %v115_v2, 4  ;;  %v125_v5 = vrot.slane %v124_v3, 2 }
  0x9c   :  { %v259_v6 = vpop.eup %258 }
  0x9d   :  { %v261_v8 = vpop.eup %260  ;;  %v118_v9 = vadd.f32 %v117_v4, %v115_v2  ;;  %v126_v10 = vadd.f32 %v125_v5, %v124_v3  ;;  %v169_v11 = vmul.f32 %v259_v6, %v162_v7 }
  0x9e   :  { %v170_v15 = vmul.f32 %v261_v8, %v167_v12 }
  0x9f   :  { %v119_v16 = vrot.slane %v118_v9, 2  ;;  %v171_v17 = vrot.slane %v169_v11, 4  ;;  %v127_v18 = vrot.slane %v126_v10, 1 }
  0xa0   :  { %v177_v19 = vrot.slane %v170_v15, 4 }
  0xa1   :  { %v120_v20 = vadd.f32 %v119_v16, %v118_v9  ;;  %v172_v21 = vadd.f32 %v171_v17, %v169_v11  ;;  %v128_v25 = vadd.f32 %v127_v18, %v126_v10 }
  0xa2   :  { %v178_v22 = vadd.f32 %v177_v19, %v170_v15 }
  0xa3   :  { %v121_v23 = vrot.slane %v120_v20, 1  ;;  %v173_v24 = vrot.slane %v172_v21, 2  ;;  %v184_v32 = vadd.f32 1.0, %v128_v25 }
  0xa4   :  { %v179_v26 = vrot.slane %v178_v22, 2 }
  0xa5   :  { %v122_v27 = vadd.f32 %v121_v23, %v120_v20  ;;  %v174_v28 = vadd.f32 %v173_v24, %v172_v21  ;;  %v190_v43 = vmul.f32 %v186_v34, %v184_v32  ;;  %v207_v45 = vmul.f32 %v192_v35, %v184_v32 }
  0xa6   :  { %v180_v29 = vadd.f32 %v179_v26, %v178_v22 }
  0xa7   :  { %v183_v30 = vadd.f32 1.0, %v122_v27  ;;  %v175_v31 = vrot.slane %v174_v28, 1 }
  0xa8   :  { %v181_v33 = vrot.slane %v180_v29, 1 }
  0xa9   :  { %v176_v36 = vadd.f32 %v175_v31, %v174_v28  ;;  %v189_v38 = vmul.f32 %v183_v30, %v378_v13  ;;  %v206_v40 = vmul.f32 %v183_v30, %v383_v14 }
  0xaa   :  { %v182_v37 = vadd.f32 %v181_v33, %v180_v29 }
  0xab   :  { %v195_v39 = vmul.f32 %v176_v36, %v383_v14  ;;  %v208_v41 = vmul.f32 %v176_v36, %v378_v13 }
  0xac   :  { %v209_v42 = vmul.f32 %v186_v34, %v182_v37  ;;  %v196_v44 = vmul.f32 %v192_v35, %v182_v37 }
  0xad   :  { %v197_v46 = vsub.f32 %v189_v38, %v195_v39  ;;  %v210_v47 = vadd.f32 %v208_v41, %v206_v40 }
  0xae   :  { %v198_v48 = vsub.f32 %v190_v43, %v196_v44  ;;  %v211_v49 = vadd.f32 %v209_v42, %v207_v45 }
  0xb0   :  { %v201_v50 = vrot.slane %v198_v48, 7  ;;  %v214_v51 = vrot.slane %v211_v49, 7 }
  0xb2   :  { %v203_v52 = vsel %vm202_vm2, %v201_v50, %v197_v46  ;;  %v215_v14 = vsel %vm202_vm2, %v214_v51, %v210_v47 }
  0xb3   :  { %205 = vst [vmem:[#allocation2] sm:$0x3] %v203_v52  ;;  %217 = vst [vmem:[#allocation4] sm:$0x3] %v215_v14 }
  0xb4   :  { %273 = shalt.err (!%p270_p4)
}
  0xb5   :  { %s274_s21 = scalar_lea.hbm %s422_s3, 32 }
  0xb6   :  { %p275_p5 = scmp.ne.s32.totalorder %s422_s3, %s274_s21  ;;  %p278_p6 = scmp.lt.u32.totalorder %s274_s21, %s422_s3 }
  0xb8   :  { %p280_p7 = pnand %p278_p6, %p275_p5 }
  0xba   :  { %283 = shalt.err (!%p280_p7)
}
  0xbb   :  { %227 = dma.vmem_to_hbm [thread:$0]  %s225_s1, 32, %s422_s3, [#allocation3]  }
  0xbc   :  { %s284_s28 = scalar_lea.vmem %s235_s17, 32  ;;  %p289_p9 = scmp.lt.s32.totalorder %s235_s17, %s235_s17 }
  0xbd   :  { %p285_p8 = scmp.ne.s32.totalorder %s235_s17, %s284_s28  ;;  %p290_p10 = scmp.lt.s32.totalorder %s284_s28, %s284_s28 }
  0xbf   :  { %p291_p11 = por %p290_p10, %p289_p9 }
  0xc1   :  { %p292_p12 = pnand %p291_p11, %p285_p8 }
  0xc3   :  { %295 = shalt.err (!%p292_p12)
}
  0xc4   :  { %s296_s5 = scalar_lea.hbm %s423_s4, 32 }
  0xc5   :  { %p297_p13 = scmp.ne.s32.totalorder %s423_s4, %s296_s5  ;;  %p300_p0 = scmp.lt.u32.totalorder %s296_s5, %s423_s4 }
  0xc7   :  { %p302_p1 = pnand %p300_p0, %p297_p13 }
  0xc9   :  { %305 = shalt.err (!%p302_p1)
}
  0xca   :  { %237 = dma.vmem_to_hbm [thread:$0]  %s235_s17, 32, %s423_s4, [#allocation5]  }
  0xcb   :  { %306 = dma.done.wait [#allocation3], 32  }
  0xcc   :  { %307 = vsyncadd [#allocation3], 4294967264 }
  0xcd   :  { %308 = dma.done.wait [#allocation5], 32  }
  0xce   :  { %309 = vsyncadd [#allocation5], 4294967264 }
  0xcf   :  { %244 = vsyncpa [#allocation3], 1 }
  0xd0   :  { %245 = vsyncpa [#allocation5], 1 }

</bundles_post_ra>
